<compile_context>
chip_gen: v7x
topology: tpu7x:2x2x1
jax: 0.10.0
libtpu: 0.0.40
codegen_flags: <defaults>
</compile_context>

<pallas_src>
import math
import functools

import jax
import jax.numpy as jnp
from jax import lax
from jax.experimental import pallas as pl
from jax.experimental.pallas import tpu as pltpu


_MASK_VALUE = -1000000000.0
# Scoped-VMEM ceiling that is safe on every generation (v7x has 64 MiB physical).
_VMEM_LIMIT = 48 * 1024 * 1024


def _pick_tile(dim, target, align):
    """Largest divisor of `dim` that is <= target AND a multiple of `align`.
    Falls back to the full dimension (always a legal block: 'equal full dim')."""
    upper = min(dim, target)
    for t in range(upper, 0, -1):
        if dim % t == 0 and t % align == 0:
            return t
    return dim


# ------------------- head-major Q/K/V projection kernel -------------------

def _head_proj_kernel(x_ref, w_ref, b_ref, o_ref, acc_ref):
    # out[b, h, rows, :] = x[b, rows, :] @ W_h  (+ bias), accumulated over the
    # d_model grid axis in a f32 VMEM scratch.  MXU inputs are bf16.
    k = pl.program_id(3)

    @pl.when(k == 0)
    def _():
        acc_ref[...] = jnp.zeros_like(acc_ref)

    acc_ref[...] += jnp.dot(x_ref[0].astype(jnp.bfloat16), w_ref[0],
                            preferred_element_type=jnp.float32)

    @pl.when(k == pl.num_programs(3) - 1)
    def _():
        o_ref[0, 0] = (acc_ref[...] + b_ref[0]).astype(o_ref.dtype)


def head_projection(x, w_hm, b_hm, *, tm_target=256, tk_target=512):
    """x: [B, S, Dm] f32; w_hm: [Hout, Dm, dk] bf16; b_hm: [Hout, 1, dk] f32
    -> [B, Hout, S, dk] f32 emitted head-major (no XLA transpose downstream)."""
    bsz, s, dm = x.shape
    hout, dm2, dk = w_hm.shape
    assert dm == dm2
    tm = _pick_tile(s, tm_target, 8)      # sublane dim of x / out blocks
    tk = _pick_tile(dm, tk_target, 128)   # lane dim of the x block

    grid = (bsz, hout, s // tm, dm // tk)
    cost = pl.CostEstimate(
        flops=int(2 * bsz * s * dm * hout * dk),
        transcendentals=0,
        bytes_accessed=int(x.size * 4 + w_hm.size * 2 + bsz * hout * s * dk * 4))

    return pl.pallas_call(
        _head_proj_kernel,
        out_shape=jax.ShapeDtypeStruct((bsz, hout, s, dk), jnp.float32),
        grid=grid,
        in_specs=[
            pl.BlockSpec((1, tm, tk), lambda b, h, i, k: (b, i, k)),
            pl.BlockSpec((1, tk, dk), lambda b, h, i, k: (h, k, 0)),
            pl.BlockSpec((1, 1, dk), lambda b, h, i, k: (h, 0, 0)),
        ],
        out_specs=pl.BlockSpec((1, 1, tm, dk), lambda b, h, i, k: (b, h, i, 0)),
        scratch_shapes=[pltpu.VMEM((tm, dk), jnp.float32)],
        compiler_params=pltpu.CompilerParams(
            dimension_semantics=("parallel", "parallel", "parallel", "arbitrary"),
            vmem_limit_bytes=_VMEM_LIMIT),
        cost_estimate=cost,
    )(x, w_hm, b_hm)


# ------------------------ output projection kernel ------------------------

def _out_proj_kernel(a_ref, w_ref, b_ref, o_ref, acc_ref):
    # out[b, rows, cols] = sum_h attn[b, h, rows, :] @ Wo_h[:, cols] + bias,
    # accumulated over the heads grid axis (innermost, "arbitrary").
    h = pl.program_id(3)

    @pl.when(h == 0)
    def _():
        acc_ref[...] = jnp.zeros_like(acc_ref)

    acc_ref[...] += jnp.dot(a_ref[0, 0].astype(jnp.bfloat16), w_ref[0],
                            preferred_element_type=jnp.float32)

    @pl.when(h == pl.num_programs(3) - 1)
    def _():
        o_ref[0] = (acc_ref[...] + b_ref[...]).astype(o_ref.dtype)


def out_projection(a_hm, w_hm, b2d, *, tm_target=256, tn_target=512):
    """a_hm: [B, H, S, dk] f32 (head-major); w_hm: [H, dk, Dm] bf16;
    b2d: [1, Dm] f32 -> [B, S, Dm] f32.  Contracts directly over heads so the
    [B,H,S,dk] -> [B,S,H*dk] transpose never touches HBM."""
    bsz, h, s, dk = a_hm.shape
    h2, dk2, dm = w_hm.shape
    assert h == h2 and dk == dk2
    tm = _pick_tile(s, tm_target, 8)
    tn = _pick_tile(dm, tn_target, 128)
    grid = (bsz, s // tm, dm // tn, h)
    cost = pl.CostEstimate(
        flops=int(2 * bsz * s * h * dk * dm),
        transcendentals=0,
        bytes_accessed=int(a_hm.size * 4 + w_hm.size * 2 + bsz * s * dm * 4))

    return pl.pallas_call(
        _out_proj_kernel,
        out_shape=jax.ShapeDtypeStruct((bsz, s, dm), jnp.float32),
        grid=grid,
        in_specs=[
            pl.BlockSpec((1, 1, tm, dk), lambda b, i, n, hh: (b, hh, i, 0)),
            pl.BlockSpec((1, dk, tn), lambda b, i, n, hh: (hh, 0, n)),
            pl.BlockSpec((1, tn), lambda b, i, n, hh: (0, n)),
        ],
        out_specs=pl.BlockSpec((1, tm, tn), lambda b, i, n, hh: (b, i, n)),
        scratch_shapes=[pltpu.VMEM((tm, tn), jnp.float32)],
        compiler_params=pltpu.CompilerParams(
            dimension_semantics=("parallel", "parallel", "parallel", "arbitrary"),
            vmem_limit_bytes=_VMEM_LIMIT),
        cost_estimate=cost,
    )(a_hm, w_hm, b2d)


# ----------------------------- attention kernels -----------------------------

def _attn_kernel_nomask(q_ref, k_ref, v_ref, o_ref, w_ref, *, scale):
    q = q_ref[0].astype(jnp.bfloat16)     # (tr, dk) rows of the KV-sharing group
    k = k_ref[0].astype(jnp.bfloat16)     # (S, dk), resident across row tiles
    v = v_ref[0].astype(jnp.bfloat16)
    s = lax.dot_general(q, k, (((1,), (1,)), ((), ())),
                        preferred_element_type=jnp.float32) * scale
    mx = jnp.max(s, axis=-1, keepdims=True)
    e = jnp.exp(s - mx)
    p = e * pl.reciprocal(jnp.sum(e, axis=-1, keepdims=True), approx=False)
    w_ref[0] = p
    o_ref[0] = jnp.dot(p.astype(jnp.bfloat16), v,
                       preferred_element_type=jnp.float32).astype(o_ref.dtype)


def _attn_kernel_masked(q_ref, k_ref, v_ref, m_ref, o_ref, w_ref, *, scale):
    q = q_ref[0].astype(jnp.bfloat16)
    k = k_ref[0].astype(jnp.bfloat16)
    v = v_ref[0].astype(jnp.bfloat16)
    s = lax.dot_general(q, k, (((1,), (1,)), ((), ())),
                        preferred_element_type=jnp.float32) * scale
    s = jnp.where(m_ref[0] == 0, jnp.float32(_MASK_VALUE), s)
    mx = jnp.max(s, axis=-1, keepdims=True)
    e = jnp.exp(s - mx)
    p = e * pl.reciprocal(jnp.sum(e, axis=-1, keepdims=True), approx=False)
    w_ref[0] = p
    o_ref[0] = jnp.dot(p.astype(jnp.bfloat16), v,
                       preferred_element_type=jnp.float32).astype(o_ref.dtype)


def gqa_attention(q_hm, k_hm, v_hm, mask_grp, mask_per_head,
                  num_heads, num_kv_heads, *, tr_target=256):
    """q_hm: [B, H, S, dk]; k_hm/v_hm: [B, Hkv, S, dk] (KV heads NOT repeated).
    mask_grp: None, [B, S, S] int8 (shared across heads), or
              [B*Hkv, G*S, S] int8 (per-head, group-major).
    Returns (attn_out [B, H, S, dk] f32, weights [B, H, S, S] f32)."""
    bsz, h, s, dk = q_hm.shape
    hkv = num_kv_heads
    g = num_heads // num_kv_heads
    scale = 1.0 / math.sqrt(dk)

    # Pure reshapes (no HBM data movement): group the G query heads that share
    # one KV head onto a single row axis.
    q = q_hm.reshape(bsz * hkv, g * s, dk)
    k = k_hm.reshape(bsz * hkv, s, dk)
    v = v_hm.reshape(bsz * hkv, s, dk)

    tr = _pick_tile(s, tr_target, 8)      # query-row tile (within one head)
    tiles_per_head = s // tr
    n_row_tiles = g * tiles_per_head

    q_spec = pl.BlockSpec((1, tr, dk), lambda gi, qi: (gi, qi, 0))
    # kv index_map ignores the row-tile axis -> fetched once per group,
    # stays VMEM-resident across all row tiles of that group.
    kv_spec = pl.BlockSpec((1, s, dk), lambda gi, qi: (gi, 0, 0))
    out_specs = [
        pl.BlockSpec((1, tr, dk), lambda gi, qi: (gi, qi, 0)),
        pl.BlockSpec((1, tr, s), lambda gi, qi: (gi, qi, 0)),
    ]
    out_shape = (
        jax.ShapeDtypeStruct((bsz * hkv, g * s, dk), jnp.float32),
        jax.ShapeDtypeStruct((bsz * hkv, g * s, s), jnp.float32),
    )
    cparams = pltpu.CompilerParams(
        dimension_semantics=("parallel", "arbitrary"),
        vmem_limit_bytes=_VMEM_LIMIT)
    cost = pl.CostEstimate(
        flops=int(4 * bsz * h * s * s * dk),
        transcendentals=int(bsz * h * s * s),
        bytes_accessed=int((q.size + k.size + v.size) * 4
                           + bsz * h * s * s * 4 + bsz * h * s * dk * 4))

    if mask_grp is None:
        kern = functools.partial(_attn_kernel_nomask, scale=scale)
        out, wts = pl.pallas_call(
            kern, out_shape=out_shape, grid=(bsz * hkv, n_row_tiles),
            in_specs=[q_spec, kv_spec, kv_spec], out_specs=out_specs,
            compiler_params=cparams, cost_estimate=cost,
        )(q, k, v)
    else:
        if mask_per_head:
            m_spec = pl.BlockSpec((1, tr, s), lambda gi, qi: (gi, qi, 0))
        else:
            # Shared mask stays [B, S, S]; map (group, row tile) -> (batch, seq tile).
            m_spec = pl.BlockSpec(
                (1, tr, s),
                lambda gi, qi: (gi // hkv, qi % tiles_per_head, 0))
        kern = functools.partial(_attn_kernel_masked, scale=scale)
        out, wts = pl.pallas_call(
            kern, out_shape=out_shape, grid=(bsz * hkv, n_row_tiles),
            in_specs=[q_spec, kv_spec, kv_spec, m_spec], out_specs=out_specs,
            compiler_params=cparams, cost_estimate=cost,
        )(q, k, v, mask_grp)

    return out.reshape(bsz, h, s, dk), wts.reshape(bsz, h, s, s)


# --------------------------- GQA module wrapper ---------------------------

class GroupedQueryAttentionPallas:
    """Pallas-TPU implementation of the PyTorch GroupedQueryAttention forward."""

    def __init__(self, d_model, num_heads, num_kv_heads, dropout=0.1, key=None):
        assert d_model % num_heads == 0
        assert d_model % num_kv_heads == 0
        assert num_heads % num_kv_heads == 0
        self.d_model = d_model
        self.num_heads = num_heads
        self.num_kv_heads = num_kv_heads
        self.num_queries_per_kv = num_heads // num_kv_heads
        self.d_k = d_model // num_heads
        self.dropout = dropout   # TODO(synk): identity (eval mode)

        if key is None:
            key = jax.random.PRNGKey(0)
        ks = jax.random.split(key, 8)
        dk = self.d_k

        def init_linear(kw, kb, out_dim, in_dim):
            # PyTorch nn.Linear default init: U(-1/sqrt(in), 1/sqrt(in)).
            bound = 1.0 / math.sqrt(in_dim)
            w = jax.random.uniform(kw, (out_dim, in_dim), jnp.float32, -bound, bound)
            b = jax.random.uniform(kb, (out_dim,), jnp.float32, -bound, bound)
            return w, b

        wq, bq = init_linear(ks[0], ks[1], num_heads * dk, d_model)
        wk, bk = init_linear(ks[2], ks[3], num_kv_heads * dk, d_model)
        wv, bv = init_linear(ks[4], ks[5], num_kv_heads * dk, d_model)
        wo, bo = init_linear(ks[6], ks[7], d_model, d_model)

        # Head-major, pre-transposed weights stored in bf16 (MXU-native).
        # wq_hm[h] = Wq[h*dk:(h+1)*dk, :].T so x @ wq_hm[h] yields head h's queries.
        self.wq_hm = jnp.transpose(
            wq.reshape(num_heads, dk, d_model), (0, 2, 1)).astype(jnp.bfloat16)
        self.wk_hm = jnp.transpose(
            wk.reshape(num_kv_heads, dk, d_model), (0, 2, 1)).astype(jnp.bfloat16)
        self.wv_hm = jnp.transpose(
            wv.reshape(num_kv_heads, dk, d_model), (0, 2, 1)).astype(jnp.bfloat16)
        # wo_hm[h, j, n] = Wo[n, h*dk + j] so the output projection contracts per head.
        self.wo_hm = jnp.transpose(
            wo.reshape(d_model, num_heads, dk), (1, 2, 0)).astype(jnp.bfloat16)

        self.bq_hm = bq.reshape(num_heads, 1, dk)
        self.bk_hm = bk.reshape(num_kv_heads, 1, dk)
        self.bv_hm = bv.reshape(num_kv_heads, 1, dk)
        self.bo = bo.reshape(1, d_model)

    def _normalize_mask(self, mask, bsz, s):
        """-> (mask int8 or None, per_head flag).  Shared masks stay [B, S, S]
        (never broadcast over heads); per-head masks become group-major."""
        if mask is None:
            return None, False
        m = (jnp.asarray(mask) != 0).astype(jnp.int8)
        if m.ndim == 2:            # [S, S]
            m = m[None, None]
        elif m.ndim == 3:          # [B, S, S]
            m = m[:, None]
        # now [B or 1, 1 or H, S, S]
        if m.shape[1] == 1:
            m = jnp.broadcast_to(m, (bsz, 1, s, s)).reshape(bsz, s, s)
            return m, False
        m = jnp.broadcast_to(m, (bsz, self.num_heads, s, s))
        m = m.reshape(bsz * self.num_kv_heads, self.num_queries_per_kv * s, s)
        return m, True

    def __call__(self, query, key, value, mask=None):
        bsz, s, _ = query.shape

        # Projections emitted head-major straight from the kernels
        # (no reshape+transpose of activations in HBM).
        q_hm = head_projection(query, self.wq_hm, self.bq_hm)   # [B, H,   S, dk]
        k_hm = head_projection(key, self.wk_hm, self.bk_hm)     # [B, Hkv, S, dk]
        v_hm = head_projection(value, self.wv_hm, self.bv_hm)   # [B, Hkv, S, dk]

        mask_grp, per_head = self._normalize_mask(mask, bsz, s)

        attn_out, attn_w = gqa_attention(
            q_hm, k_hm, v_hm, mask_grp, per_head,
            self.num_heads, self.num_kv_heads)

        # Output projection contracts over heads directly from head-major layout.
        out = out_projection(attn_out, self.wo_hm, self.bo)     # [B, S, d_model]
        return out, attn_w


# ------------------------- pure-JAX reference (test) -------------------------

def _reference_forward(mod, query, key, value, mask):
    wq = mod.wq_hm.astype(jnp.float32)
    wk = mod.wk_hm.astype(jnp.float32)
    wv = mod.wv_hm.astype(jnp.float32)
    wo = mod.wo_hm.astype(jnp.float32)
    Q = jnp.einsum("bsd,hdk->bhsk", query, wq) + mod.bq_hm[None]
    K = jnp.einsum("bsd,hdk->bhsk", key, wk) + mod.bk_hm[None]
    V = jnp.einsum("bsd,hdk->bhsk", value, wv) + mod.bv_hm[None]
    K = jnp.repeat(K, mod.num_queries_per_kv, axis=1)
    V = jnp.repeat(V, mod.num_queries_per_kv, axis=1)
    scores = jnp.einsum("bhqk,bhsk->bhqs", Q, K) / math.sqrt(mod.d_k)
    if mask is not None:
        m = jnp.asarray(mask)
        if m.ndim == 2:
            m = m[None, None]
        elif m.ndim == 3:
            m = m[:, None]
        scores = jnp.where(m == 0, _MASK_VALUE, scores)
    wts = jax.nn.softmax(scores, axis=-1)
    attn = jnp.einsum("bhqs,bhsk->bhqk", wts, V)
    out = jnp.einsum("bhsk,hkd->bsd", attn, wo) + mod.bo
    return out, wts


# --------------------------------- main ----------------------------------

if __name__ == "__main__":
    B, S, D = 2, 8, 32
    NUM_HEADS, NUM_KV_HEADS = 4, 2

    root = jax.random.PRNGKey(0)
    k_param, k_q, k_k, k_v = jax.random.split(root, 4)

    gqa = GroupedQueryAttentionPallas(D, NUM_HEADS, NUM_KV_HEADS, dropout=0.1,
                                      key=k_param)

    query = jax.random.normal(k_q, (B, S, D), dtype=jnp.float32)
    key_in = jax.random.normal(k_k, (B, S, D), dtype=jnp.float32)
    value = jax.random.normal(k_v, (B, S, D), dtype=jnp.float32)

    # ---- maskless path ----
    out, attn_w = gqa(query, key_in, value, mask=None)
    out = jax.block_until_ready(out)
    attn_w = jax.block_until_ready(attn_w)
    assert out.shape == (B, S, D)
    assert attn_w.shape == (B, NUM_HEADS, S, S)
    assert bool(jnp.all(jnp.isfinite(out)))
    assert bool(jnp.allclose(attn_w.sum(-1), 1.0, atol=1e-3))

    ref_out, ref_w = _reference_forward(gqa, query, key_in, value, None)
    assert bool(jnp.allclose(out, ref_out, atol=7.5e-2, rtol=7.5e-2))
    assert bool(jnp.allclose(attn_w, ref_w, atol=3e-2))

    # ---- masked path (PyTorch-style [B, 1, S, S] causal mask) ----
    causal = jnp.tril(jnp.ones((S, S), dtype=jnp.int32))[None, None]
    causal = jnp.broadcast_to(causal, (B, 1, S, S))
    out_m, attn_w_m = gqa(query, key_in, value, mask=causal)
    out_m = jax.block_until_ready(out_m)
    attn_w_m = jax.block_until_ready(attn_w_m)
    assert out_m.shape == (B, S, D)
    assert attn_w_m.shape == (B, NUM_HEADS, S, S)
    future = jnp.triu(jnp.ones((S, S), dtype=jnp.float32), k=1)[None, None]
    assert bool(jnp.max(attn_w_m * future) < 1e-6)

    ref_out_m, ref_w_m = _reference_forward(gqa, query, key_in, value, causal)
    assert bool(jnp.allclose(out_m, ref_out_m, atol=7.5e-2, rtol=7.5e-2))
    assert bool(jnp.allclose(attn_w_m, ref_w_m, atol=3e-2))

    print("KERNEL_OK")
</pallas_src>

<mosaic_0001>
module attributes {stable_mosaic.version = 11 : i64} {
  func.func @_head_proj_kernel(%arg0: i32, %arg1: i32, %arg2: i32, %arg3: i32, %arg4: memref<1x8x32xf32, #tpu.memory_space<vmem>>, %arg5: memref<1x32x8xbf16, #tpu.memory_space<vmem>>, %arg6: memref<1x1x8xf32, #tpu.memory_space<vmem>>, %arg7: memref<1x1x8x8xf32, #tpu.memory_space<vmem>>, %arg8: memref<8x8xf32, #tpu.memory_space<vmem>>) attributes {dimension_semantics = [#tpu.dimension_semantics<parallel>, #tpu.dimension_semantics<parallel>, #tpu.dimension_semantics<parallel>, #tpu.dimension_semantics<arbitrary>], iteration_bounds = array<i64: 2, 4, 1, 1>, scalar_prefetch = 0 : i64, scratch_operands = 1 : i64, tpu.core_type = #tpu.core_type<tc>, window_params = [{transform_indices = @transform_0, window_bounds = array<i64: 1, 8, 32>}, {transform_indices = @transform_1, window_bounds = array<i64: 1, 32, 8>}, {transform_indices = @transform_2, window_bounds = array<i64: 1, 1, 8>}, {transform_indices = @transform_3, window_bounds = array<i64: 1, 1, 8, 8>}]} {
    %c0_i32 = arith.constant 0 : i32
    %0 = arith.cmpi eq, %arg3, %c0_i32 : i32
    %1 = arith.extui %0 : i1 to i32
    %c0_i32_0 = arith.constant 0 : i32
    %2 = arith.cmpi ne, %1, %c0_i32_0 : i32
    scf.if %2 {
      %cst_12 = arith.constant 0.000000e+00 : f32
      %15 = vector.broadcast %cst_12 : f32 to vector<8x8xf32>
      %c0_13 = arith.constant 0 : index
      %c0_14 = arith.constant 0 : index
      %16 = vector.load %arg8[%c0_13, %c0_14] : memref<8x8xf32, #tpu.memory_space<vmem>>, vector<8x8xf32>
      tpu.vector_store %arg8[%c0_13, %c0_14], %15 {strides = array<i32>} : memref<8x8xf32, #tpu.memory_space<vmem>>, vector<8x8xf32>,
    } else {
    }
    %c0 = arith.constant 0 : index
    %c0_1 = arith.constant 0 : index
    %3 = vector.load %arg8[%c0, %c0_1] : memref<8x8xf32, #tpu.memory_space<vmem>>, vector<8x8xf32>
    %c0_2 = arith.constant 0 : index
    %c0_3 = arith.constant 0 : index
    %c0_4 = arith.constant 0 : index
    %4 = vector.load %arg4[%c0_2, %c0_3, %c0_4] : memref<1x8x32xf32, #tpu.memory_space<vmem>>, vector<1x8x32xf32>
    %5 = vector.shape_cast %4 : vector<1x8x32xf32> to vector<8x32xf32>
    %6 = arith.truncf %5 : vector<8x32xf32> to vector<8x32xbf16>
    %c0_5 = arith.constant 0 : index
    %c0_6 = arith.constant 0 : index
    %c0_7 = arith.constant 0 : index
    %7 = vector.load %arg5[%c0_5, %c0_6, %c0_7] : memref<1x32x8xbf16, #tpu.memory_space<vmem>>, vector<1x32x8xbf16>
    %8 = vector.shape_cast %7 : vector<1x32x8xbf16> to vector<32x8xbf16>
    %cst = arith.constant dense<0.000000e+00> : vector<8x8xf32>
    %9 = tpu.matmul %6, %8, %cst {dimension_numbers = #tpu.dot_dimension_numbers<[1], [0], [0], [1], [0, 0, 1, 1], [], []>} : vector<8x32xbf16>, vector<32x8xbf16>, vector<8x8xf32> -> vector<8x8xf32>
    %10 = arith.addf %3, %9 : vector<8x8xf32>
    %c0_8 = arith.constant 0 : index
    %c0_9 = arith.constant 0 : index
    %11 = vector.load %arg8[%c0_8, %c0_9] : memref<8x8xf32, #tpu.memory_space<vmem>>, vector<8x8xf32>
    tpu.vector_store %arg8[%c0_8, %c0_9], %10 {strides = array<i32>} : memref<8x8xf32, #tpu.memory_space<vmem>>, vector<8x8xf32>,
    %c0_i32_10 = arith.constant 0 : i32
    %12 = arith.cmpi eq, %arg3, %c0_i32_10 : i32
    %13 = arith.extui %12 : i1 to i32
    %c0_i32_11 = arith.constant 0 : i32
    %14 = arith.cmpi ne, %13, %c0_i32_11 : i32
    scf.if %14 {
      %c0_12 = arith.constant 0 : index
      %c0_13 = arith.constant 0 : index
      %15 = vector.load %arg8[%c0_12, %c0_13] : memref<8x8xf32, #tpu.memory_space<vmem>>, vector<8x8xf32>
      %c0_14 = arith.constant 0 : index
      %c0_15 = arith.constant 0 : index
      %c0_16 = arith.constant 0 : index
      %16 = vector.load %arg6[%c0_14, %c0_15, %c0_16] : memref<1x1x8xf32, #tpu.memory_space<vmem>>, vector<1x1x8xf32>
      %17 = vector.shape_cast %16 : vector<1x1x8xf32> to vector<1x8xf32>
      %18 = vector.broadcast %17 : vector<1x8xf32> to vector<8x8xf32>
      %19 = arith.addf %15, %18 : vector<8x8xf32>
      %c0_17 = arith.constant 0 : index
      %c0_18 = arith.constant 0 : index
      %c0_19 = arith.constant 0 : index
      %c0_20 = arith.constant 0 : index
      %20 = vector.load %arg7[%c0_17, %c0_18, %c0_19, %c0_20] : memref<1x1x8x8xf32, #tpu.memory_space<vmem>>, vector<1x1x8x8xf32>
      %21 = vector.shape_cast %20 : vector<1x1x8x8xf32> to vector<8x8xf32>
      %22 = vector.shape_cast %19 : vector<8x8xf32> to vector<1x1x8x8xf32>
      tpu.vector_store %arg7[%c0_17, %c0_18, %c0_19, %c0_20], %22 {strides = array<i32>} : memref<1x1x8x8xf32, #tpu.memory_space<vmem>>, vector<1x1x8x8xf32>,
    } else {
    }
    return
  }
  func.func @transform_0(%arg0: i32, %arg1: i32, %arg2: i32, %arg3: i32) -> (i32, i32, i32) {
    %c0_i32 = arith.constant 0 : i32
    return %arg0, %arg2, %arg3 : i32, i32, i32
  }
  func.func @transform_1(%arg0: i32, %arg1: i32, %arg2: i32, %arg3: i32) -> (i32, i32, i32) {
    %c0_i32 = arith.constant 0 : i32
    %c0_i32_0 = arith.constant 0 : i32
    return %arg1, %arg3, %c0_i32 : i32, i32, i32
  }
  func.func @transform_2(%arg0: i32, %arg1: i32, %arg2: i32, %arg3: i32) -> (i32, i32, i32) {
    %c0_i32 = arith.constant 0 : i32
    %c0_i32_0 = arith.constant 0 : i32
    %c0_i32_1 = arith.constant 0 : i32
    return %arg1, %c0_i32, %c0_i32_0 : i32, i32, i32
  }
  func.func @transform_3(%arg0: i32, %arg1: i32, %arg2: i32, %arg3: i32) -> (i32, i32, i32, i32) {
    %c0_i32 = arith.constant 0 : i32
    %c0_i32_0 = arith.constant 0 : i32
    return %arg0, %arg1, %arg2, %c0_i32 : i32, i32, i32, i32
  }
}

</mosaic_0001>

<bundles_post_ra>
// kernel: tpu_custom_call.1
= control target key start
LH: loop header
LB: loop body
LE: loop exit
PB: predicated region body
PF: predicated region fallthrough
CT: control target
= control target key end

     0   :  { %8 = vsyncpa [#allocation4], 0  ;;  %s853_s0 = inlined_call_operand.vmem [shape: f32[2,8,32], index: 0, kind: input, shape index: {}]   ;;  %s854_s1 = inlined_call_operand.vmem [shape: bf16[4,32,8], index: 1, kind: input, shape index: {}]   ;;  %s855_s2 = inlined_call_operand.vmem [shape: f32[4,1,8], index: 2, kind: input, shape index: {}]   ;;  %s856_s3 = inlined_call_operand.hbm [shape: f32[2,4,8,8], index: 3, kind: output, shape index: {}]  }
   0x1   :  { %10 = vsyncpa [#allocation4 + $0x1], 0  ;;  %s707_s12 = smov 0   ;;  %s709_s13 = smov 0  }
   0x2   :  { %s711_s14 = smov 0   ;;  %s713_s15 = smov 0  }
   0x3   :  { %s715_s16 = smov 0   ;;  %s717_s17 = smov 0  }
   0x4   :  { %s719_s18 = smov 0   ;;  %s721_s19 = smov 0  }
   0x5 LB: > { %s483_s20 = sadd.s32 4294967295, %s682_s19   ;;  %s484_s21 = sadd.s32 4294967294, %s682_s19   ;;  %s682_s19 = sphi %s721_s19, %s16_s19   ;;  %s678_s18 = sphi %s719_s18, %s865_s18   ;;  %s674_s17 = sphi %s717_s17, %s864_s17   ;;  %s670_s16 = sphi %s715_s16, %s863_s16   ;;  %s666_s15 = sphi %s713_s15, %s862_s15   ;;  %s662_s14 = sphi %s711_s14, %s861_s14   ;;  %s658_s13 = sphi %s709_s13, %s860_s13   ;;  %s654_s12 = sphi %s707_s12, %s859_s12  }
   0x6   : > { %s38_s22 = sadd.s32 1, %s674_s17  ;;  %s42_s23 = sadd.s32 1, %s678_s18 }
   0x7   : > { %p40_p0 = scmp.ge.s32.totalorder %s38_s22, 4  ;;  %p147_p1 = scmp.ne.s32.totalorder %s662_s14, %s658_s13 }
   0x8   : > { %p148_p2 = scmp.eq.s32.totalorder %s483_s20, 7  ;;  %p153_p5 = scmp.ne.s32.totalorder %s658_s13, %s654_s12 }
   0x9   : > { %s867_s22 = smov (%p40_p0, %s38_s22), 0  ;;  %s869_s23 = smov (!%p40_p0, %s42_s23), %s678_s18 }
   0xa   : > { %s131_s24 = ssub.s32 %s674_s17, %s867_s22  ;;  %p758_p3 = por %p148_p2, %p147_p1 }
   0xb   : > { %p44_p4 = scmp.ge.s32.totalorder %s869_s23, 2  ;;  %p154_p6 = scmp.eq.s32.totalorder %s484_s21, 7 }
   0xc   : > { %p487_p7 = scmp.ge.s32.totalorder %s682_s19, 1  ;;  %p204_p9 = scmp.lt.s32.totalorder %s682_s19, 9 }
   0xd   : > { %s871_s23 = smov (%p44_p4, %s869_s23), 0  ;;  %p767_p8 = por %p154_p6, %p153_p5 }
   0xe   : > { %s130_s27 = ssub.s32 %s678_s18, %s871_s23  ;;  %s137_s28 = sadd.s32 1, %s662_s14 }
   0xf   : > { %s132_s29 = sor.u32 %s131_s24, %s130_s27  ;;  %p205_p10 = pnand %p487_p7, %p204_p9 }
  0x10   : > { %p135_p11 = scmp.eq.s32.totalorder %s132_s29, 0  ;;  %p256_p12 = scmp.lt.s32.totalorder (!%p205_p10), %s666_s15, 3  ;;  %vm273_vm0 = vcmask (!%p205_p10), 64512   ;;  %v684_v0 = vmov (!%p205_p10), 0.0   ;;  %vm685_vm1 = vmmov (!%p205_p10), 0   ;;  %vm294_vm2 = vcmask (!%p205_p10), 261120  }
  0x11   : > { %208 = sbr.rel (%p205_p10) target bundleno = 274 (0x112), region = 32  ;;  %p245_p13 = scmp.lt.s32.totalorder (!%p205_p10), %s670_s16, 1  ;;  %505 = vmatprep.subr.bf16.mxu0 (!%p205_p10), %v684_v0  ;;  %509 = vmatprep.mubr.msk.bf16.mxu0 (!%p205_p10), %vm685_vm1, %v684_v0  ;;  %274 = vst.msk [vmem:[#allocation2] sm:$0xff] (!%p205_p10), %vm273_vm0, %v684_v0 }
  0x12   : > { %s776_s30 = scalar_select %p135_p11, %s662_s14, %s137_s28  }
  0x13   : > { %s242_s24 = sand.u32 (!%p205_p10), 1, %s658_s13   ;;  %s497_s28 = sshll.u32 (!%p205_p10), %s670_s16, 2 }
  0x14   : > { %s488_s27 = sshll.u32 (!%p205_p10), %s242_s24, 3  ;;  %s367_s7 = sadd.s32 (!%p205_p10), %s666_s15, %s497_s28 }
  0x15   : > { %s498_s8 = sshll.u32 (!%p205_p10), %s367_s7, 7 }
  0x18   : > { %s257_s4 = scalar_select %p256_p12, %s666_s15, 3  ;;  %v275_v5 = vld [vmem:[#allocation2] sm:$0xff] }
  0x19   : > { %s246_s5 = scalar_select %p245_p13, %s670_s16, 1 }
  0x1a   : > { %s501_s6 = sshll.u32 %s257_s4, 4  ;;  %s355_s16 = scalar_lea.sflag [#allocation4], %s242_s24 }
  0x1b   : > { %s263_s9 = scalar_lea.vmem %s854_s1, %s501_s6  ;;  %s489_s10 = sshll.u32 %s246_s5, 3 }
  0x1c   : > { %v586_v1 = vld [vmem:[%s263_s9] sm:$0xff]   ;;  %s254_s21 = scalar_lea.vmem %s853_s0, %s489_s10  ;;  %v587_v2 = vld [vmem:[%s263_s9 + $0x8] sm:$0xff]   ;;  %s267_s6 = scalar_lea.vmem %s855_s2, %s257_s4 }
  0x1d   : > { %506 = vmatpush3.bf16.msra.mxu0 %v586_v1  ;;  %v276_v3 = vld [vmem:[%s254_s21] sm:$0xff]  ;;  %s244_s9 = scalar_lea.vmem [#allocation3], %s488_s27  ;;  %s799_s21 = scalar_lea.hbm %s856_s3, %s498_s8 }
  0x1e   : > { %507 = vmatprep.subr.bf16.mxu0 %v684_v0  ;;  %v277_v4 = vpack.c.bf16 %v276_v3, %v276_v3  ;;  %v495_v11 = vld [vmem:[%s267_s6] ss:$0 sm:$0xff]  ;;  %s371_s10 = sshll.u32 %s244_s9, 4  ;;  %s686_s4 = smov [#allocation3]   ;;  %s801_s10 = int_to_ptr.vmem [resolvable:$true] %s371_s10 }
  0x1f   : > { %s588_s15 = scalar_lea.vmem %s801_s10, 128  ;;  %s592_s27 = sshll.u32 %s686_s4, 4  ;;  %s593_s27 = int_to_ptr.vmem [resolvable:$false] %s592_s27 }
  0x20   : > { %p589_p0 = scmp.ne.s32.totalorder %s801_s10, %s588_s15  ;;  %s594_s28 = scalar_lea.vmem %s593_s27, 256 }
  0x21   : > { %508 = vmatpush3.bf16.msra.mxu0 %v587_v2  ;;  %p595_p4 = scmp.lt.s32.totalorder %s801_s10, %s593_s27  ;;  %p596_p5 = scmp.lt.s32.totalorder %s594_s28, %s588_s15 }
  0x22   : > { %p590_p1 = pnand %p589_p0, %p758_p3 }
  0x23   : > { %p597_p6 = por %p596_p5, %p595_p4 }
  0x24   : > { %510 = vmatmul.mubr.msk.bf16.vlgmr.msra.gmra.mrb[0].mxu0 %vm294_vm2, %v277_v4  ;;  %p591_p2 = pneg %p590_p1 }
  0x26   : > { %p598_p7 = pnand %p597_p6, %p591_p2 }
  0xf7   : > { %v332_v6 = vpop.f32.mrb[0].mxu0 }
  0xf8   : > { %v338_v7 = vadd.f32 %v332_v6, %v275_v5  ;;  %v511_v8 = vpop.f32.mrb[1].mxu0 }
  0xf9   : > { %v335_v9 = vpop.f32.mrb[2].mxu0 }
  0xfa   : > { %340 = vst.msk [vmem:[#allocation2] sm:$0xff] %vm273_vm0, %v338_v7  ;;  %v512_v10 = vpop.f32.mrb[3].mxu0 }
 0x101   : > { %v344_v12 = vld [vmem:[#allocation2] sm:$0xff] }
 0x102   : > { %v352_v13 = vadd.f32 %v495_v11, %v344_v12 }
 0x104   : > { %353 = vst.msk [vmem:[%s244_s9] sm:$0xff] %vm273_vm0, %v352_v13 }
 0x105   : > { %601 = shalt.err (!%p598_p7)
}
 0x106   : > { %s602_s24 = scalar_lea.hbm %s799_s21, 128  ;;  %s606_s6 = scalar_lea.hbm %s856_s3, 1024 }
 0x107   : > { %p603_p9 = scmp.ne.s32.totalorder %s799_s21, %s602_s24  ;;  %p607_p12 = scmp.lt.u32.totalorder %s799_s21, %s856_s3 }
 0x108   : > { %p608_p13 = scmp.lt.u32.totalorder %s606_s6, %s602_s24  ;;  %p610_p1 = scmp.lt.u32.totalorder %s602_s24, %s799_s21 }
 0x109   : > { %p604_p10 = pnand %p603_p9, %p758_p3 }
 0x10a   : > { %p609_p0 = por %p608_p13, %p607_p12 }
 0x10b   : > { %p605_p11 = pneg %p604_p10 }
 0x10c   : > { %p611_p2 = por %p610_p1, %p609_p0 }
 0x10e   : > { %p612_p4 = pnand %p611_p2, %p605_p11 }
 0x110   : > { %615 = shalt.err (!%p612_p4)
}
 0x111   : > { %513 = dma.vmem_to_hbm [thread:$0]  (%p758_p3), %s801_s10, 128, %s799_s21, %s355_s16  }
 0x112 PF: > { %p519_p5 = scmp.ge.s32.totalorder %s682_s19, 2  ;;  %s383_s9 = sand.u32 1, %s654_s12  }
 0x113   : > { %s384_s11 = scalar_lea.sflag [#allocation4], %s383_s9 }
 0x114   : > { %p516_p6 = pnand %p519_p5, %p767_p8 }
 0x116   : > { %649 = dma.done.wait (!%p516_p6), %s384_s11, 128  }
 0x117   : > { %651 = vsyncadd (!%p516_p6), %s384_s11, 4294967168  ;;  %s16_s19 = sadd.s32 1, %s682_s19   ;;  %s859_s12 = smov %s658_s13 }
 0x118   : > { %p13_p7 = scmp.ge.s32.totalorder %s16_s19, 10   ;;  %s860_s13 = smov %s662_s14 }
 0x119   : > { %s861_s14 = smov %s776_s30  ;;  %s862_s15 = smov %s674_s17 }
 0x11a   : > { %s863_s16 = smov %s678_s18  ;;  %s864_s17 = smov %s867_s22 }
 0x11b   : > { %s865_s18 = smov %s871_s23  ;;  %15 = sbr.rel (!%p13_p7) target bundleno = 5 (0x5), region = 81 }
 0x122   :  { %389 = vsyncpa [#allocation4], 1 }
 0x123   :  { %391 = vsyncpa [#allocation4 + $0x1], 1 }

</bundles_post_ra>
